<compile_context>
chip_gen: v7x
topology: tpu7x:2x2x1
jax: 0.10.0
libtpu: 0.0.40
codegen_flags: <defaults>
</compile_context>

<pallas_src>
import math

import jax
import jax.numpy as jnp
from jax.experimental import pallas as pl
from jax.experimental.pallas import tpu as pltpu


def _prelu(y, a):
    # PReLU with a single (scalar) slope parameter, as in nn.PReLU() default.
    return jnp.where(y >= 0, y, a * y)


def tac_kernel(x_ref, w1_ref, w2_ref, w3a_ref, w3b_ref,
               b1_ref, b2_ref, b3_ref, a_ref, out_ref):
    G, n_mic, Tf, L = x_ref.shape              # L = P*C (lane-dense), Tf = Tt//P
    a1, a2, a3 = a_ref[0], a_ref[1], a_ref[2]  # PReLU slopes from SMEM
    mm_dtype = w1_ref.dtype                    # bf16 (or f32) MXU operands

    x = x_ref[...]                             # (G, n_mic, Tf, L) f32
    x2 = x.reshape(G * n_mic * Tf, L)          # leading-dim merge only (free)

    # lin1 + PReLU  (bf16 operands on MXU, f32 accumulate, f32 elementwise)
    h0 = _prelu(
        jnp.dot(x2.astype(mm_dtype), w1_ref[...],
                preferred_element_type=jnp.float32) + b1_ref[...], a1)

    # mic mean (1/n_mic pre-folded into W2 by the wrapper) -> lin2 + PReLU
    s = jnp.sum(h0.reshape(G, n_mic, Tf, L), axis=1).reshape(G * Tf, L)
    h1 = _prelu(
        jnp.dot(s.astype(mm_dtype), w2_ref[...],
                preferred_element_type=jnp.float32) + b2_ref[...], a2)

    # lin3 on concat(h0, h1) along channels == h0 @ W3a^T + h1 @ W3b^T + b3
    y_a = jnp.dot(h0.astype(mm_dtype), w3a_ref[...],
                  preferred_element_type=jnp.float32)
    y_b = jnp.dot(h1.astype(mm_dtype), w3b_ref[...],
                  preferred_element_type=jnp.float32) + b3_ref[...]
    y = _prelu(y_a.reshape(G, n_mic, Tf, L) + y_b.reshape(G, 1, Tf, L), a3)

    out_ref[...] = x + y


def _pick_tiles(B, n_mic, T, C, P, block_budget_bytes, itemsize=4):
    """Pick (G groups per block, Tt time steps per block).

    Tt is a multiple of 8*P (tile-aligned folded rows), chosen to fill the
    VMEM budget with one group (capped at 512 steps); T is later padded up to
    a multiple of Tt.  The grid is forced to have >= 2 program instances so
    both v7x TensorCores get work.
    """
    unit = 8 * P                             # Tt // P must be a multiple of 8
    per_t = n_mic * C * itemsize             # bytes per time step per group
    tt = (min(512, max(unit, block_budget_bytes // per_t)) // unit) * unit
    tt = max(unit, tt)
    tt = min(tt, pl.cdiv(T, unit) * unit)    # never exceed (padded) T

    per_group = tt * per_t
    g = 1
    for d in range(B, 0, -1):
        if B % d == 0 and d * per_group <= block_budget_bytes:
            g = d
            break

    if (B // g) * pl.cdiv(T, tt) < 2:        # ensure >= 2 programs (v7x megacore)
        tt_half = max(unit, pl.cdiv(pl.cdiv(T, 2), unit) * unit)
        if pl.cdiv(T, tt_half) >= 2:
            tt = tt_half
        elif g > 1:
            g = next(d for d in range(g - 1, 0, -1) if B % d == 0)
    return g, tt


def tac_forward(x, n_mic, params, *, matmul_dtype=jnp.bfloat16,
                block_budget_bytes=None, vmem_limit_bytes=None):
    """x: (B*n_mic, T, C) float32 -> (B*n_mic, T, C) float32."""
    w1, b1, a1, w2, b2, a2, w3, b3, a3 = params
    BM, T, C = x.shape
    assert BM % n_mic == 0
    B = BM // n_mic

    # Lane-fold factor: P consecutive time steps -> one 128-aligned lane row.
    P = 128 // math.gcd(C, 128)
    if P * C > 1024:         # block-diag weights would be too big; fall back
        P = 1                # (block last dim then equals the full C dim)
    L = P * C

    # Per-chip VMEM budget (v5e/v6e: ~96 MiB limit / 8 MiB blocks;
    # v7x: ~48 MiB / 4 MiB -- fits its 64 MiB per-core VMEM with headroom).
    if vmem_limit_bytes is None or block_budget_bytes is None:
        try:
            cap = int(pltpu.get_tpu_info().vmem_capacity_bytes)
        except Exception:
            cap = 64 * 1024 * 1024           # conservative fallback (v7x-sized)
        if vmem_limit_bytes is None:
            vmem_limit_bytes = min((cap * 3) // 4, 100 * 1024 * 1024)
        if block_budget_bytes is None:
            block_budget_bytes = vmem_limit_bytes // 12

    G, Tt = _pick_tiles(B, n_mic, T, C, P, block_budget_bytes)
    T_pad = Tt * pl.cdiv(T, Tt)

    # Pad T (padded rows carry PReLU(b)-derived garbage; nothing reduces over
    # T -- the mic mean is over mics -- so padding cannot leak; it is sliced
    # off at the end).  Then fold: contiguous reshape, free in HBM.
    x4 = x.reshape(B, n_mic, T, C)
    if T_pad != T:
        x4 = jnp.pad(x4, ((0, 0), (0, 0), (0, T_pad - T), (0, 0)))
    xf = x4.reshape(B, n_mic, T_pad // P, L)

    # Block-diagonal, pre-transposed weights (canonical (M,K)x(K,N) MXU form),
    # cast once for the MXU; 1/n_mic folded into W2 so the kernel mic-sums.
    eye = jnp.eye(P, dtype=jnp.float32)
    w1t = jnp.kron(eye, w1.T).astype(matmul_dtype)
    w2t = jnp.kron(eye, (w2 / n_mic).T).astype(matmul_dtype)
    w3at = jnp.kron(eye, w3[:, :C].T).astype(matmul_dtype)   # h0 half of concat
    w3bt = jnp.kron(eye, w3[:, C:].T).astype(matmul_dtype)   # h1 half of concat
    b1r = jnp.tile(b1.astype(jnp.float32), P).reshape(1, L)
    b2r = jnp.tile(b2.astype(jnp.float32), P).reshape(1, L)
    b3r = jnp.tile(b3.astype(jnp.float32), P).reshape(1, L)
    alphas = jnp.stack([a1, a2, a3]).astype(jnp.float32)      # (3,) -> SMEM

    Tf = Tt // P
    grid = (B // G, T_pad // Tt)

    xspec = pl.BlockSpec((G, n_mic, Tf, L), lambda i, j: (i, 0, j, 0))
    wspec = pl.BlockSpec((L, L), lambda i, j: (0, 0))
    bspec = pl.BlockSpec((1, L), lambda i, j: (0, 0))
    aspec = pl.BlockSpec(memory_space=pltpu.MemorySpace.SMEM)

    outf = pl.pallas_call(
        tac_kernel,
        out_shape=jax.ShapeDtypeStruct((B, n_mic, T_pad // P, L), x.dtype),
        grid_spec=pltpu.PrefetchScalarGridSpec(
            num_scalar_prefetch=0,
            grid=grid,
            in_specs=[
                xspec,                          # x block (lane-dense, folded)
                wspec, wspec, wspec, wspec,     # W1bd, W2bd/n_mic, W3a_bd, W3b_bd
                bspec, bspec, bspec,            # b1, b2, b3 (tiled to L lanes)
                aspec,                          # PReLU slopes (SMEM)
            ],
            out_specs=xspec,
        ),
        compiler_params=pltpu.CompilerParams(
            dimension_semantics=("parallel", "parallel"),
            vmem_limit_bytes=int(vmem_limit_bytes)),
    )(xf, w1t, w2t, w3at, w3bt, b1r, b2r, b3r, alphas)

    out4 = outf.reshape(B, n_mic, T_pad, C)
    if T_pad != T:
        out4 = out4[:, :, :T, :]
    return out4.reshape(BM, T, C)


def ref_forward(x, n_mic, params):
    """Pure-JAX f32 reference mirroring the PyTorch forward exactly."""
    w1, b1, a1, w2, b2, a2, w3, b3, a3 = params
    _, T, C = x.shape
    h0 = _prelu(x @ w1.T + b1, a1).reshape(-1, n_mic, T, C)
    h1 = _prelu(h0.mean(axis=1) @ w2.T + b2, a2).reshape(-1, 1, T, C)
    h1 = jnp.tile(h1, (1, n_mic, 1, 1))
    cat = jnp.concatenate((h0, h1), axis=-1)
    y = _prelu(cat @ w3.T + b3, a3).reshape(-1, T, C)
    return x + y


def init_params(key, input_dim):
    """Deterministic init matching torch.nn.Linear / nn.PReLU default scheme."""
    C = input_dim
    ks = jax.random.split(key, 6)
    u = lambda k, shape, fan_in: jax.random.uniform(
        k, shape, jnp.float32, -1.0 / jnp.sqrt(fan_in), 1.0 / jnp.sqrt(fan_in))
    w1 = u(ks[0], (C, C), C)
    b1 = u(ks[1], (C,), C)
    w2 = u(ks[2], (C, C), C)
    b2 = u(ks[3], (C,), C)
    w3 = u(ks[4], (C, 2 * C), 2 * C)
    b3 = u(ks[5], (C,), 2 * C)
    a1 = jnp.float32(0.25)
    a2 = jnp.float32(0.25)
    a3 = jnp.float32(0.25)
    return (w1, b1, a1, w2, b2, a2, w3, b3, a3)


if __name__ == "__main__":
    B, n_mic, T, C = 2, 4, 16, 32
    key = jax.random.PRNGKey(0)
    kx, kp = jax.random.split(key)
    x = jax.random.normal(kx, (B * n_mic, T, C), dtype=jnp.float32)
    params = init_params(kp, C)

    ref = jax.block_until_ready(ref_forward(x, n_mic, params))

    # 1) f32-MXU path: checks kernel structure / tiling / fold / fusion.
    #    (Tolerance 1e-4: default-precision f32 matmuls may lower to
    #    multi-pass bf16 on TPU.)
    out_f32 = jax.block_until_ready(
        tac_forward(x, n_mic, params, matmul_dtype=jnp.float32))
    assert out_f32.shape == (B * n_mic, T, C)
    err32 = jnp.max(jnp.abs(out_f32 - ref))
    assert jnp.allclose(out_f32, ref, atol=1e-4, rtol=1e-4), (
        f"f32 path max abs err {err32}")

    # 2) Default bf16-MXU path (perf config): bf16 operands / f32 accumulate,
    #    so the tolerance vs. the exact f32 reference is necessarily looser.
    out = jax.block_until_ready(tac_forward(x, n_mic, params))
    assert out.shape == (B * n_mic, T, C)
    err = jnp.max(jnp.abs(out - ref))
    assert jnp.allclose(out, ref, atol=5e-2, rtol=5e-2), (
        f"bf16 path max abs err {err}")

    print("KERNEL_OK")
</pallas_src>

<mosaic_0001>
module attributes {stable_mosaic.version = 11 : i64} {
  func.func @tac_kernel(%arg0: i32, %arg1: i32, %arg2: memref<1x4x8x128xf32, #tpu.memory_space<vmem>>, %arg3: memref<128x128xf32, #tpu.memory_space<vmem>>, %arg4: memref<128x128xf32, #tpu.memory_space<vmem>>, %arg5: memref<128x128xf32, #tpu.memory_space<vmem>>, %arg6: memref<128x128xf32, #tpu.memory_space<vmem>>, %arg7: memref<1x128xf32, #tpu.memory_space<vmem>>, %arg8: memref<1x128xf32, #tpu.memory_space<vmem>>, %arg9: memref<1x128xf32, #tpu.memory_space<vmem>>, %arg10: memref<3xf32, #tpu.memory_space<smem>>, %arg11: memref<1x4x8x128xf32, #tpu.memory_space<vmem>>) attributes {dimension_semantics = [#tpu.dimension_semantics<parallel>, #tpu.dimension_semantics<parallel>], iteration_bounds = array<i64: 2, 1>, scalar_prefetch = 0 : i64, scratch_operands = 0 : i64, tpu.core_type = #tpu.core_type<tc>, window_params = [{transform_indices = @transform_0, window_bounds = array<i64: 1, 4, 8, 128>}, {pipeline_mode = #tpu.pipeline_mode<synchronous>, transform_indices = @transform_1, window_bounds = array<i64: 128, 128>}, {pipeline_mode = #tpu.pipeline_mode<synchronous>, transform_indices = @transform_2, window_bounds = array<i64: 128, 128>}, {pipeline_mode = #tpu.pipeline_mode<synchronous>, transform_indices = @transform_3, window_bounds = array<i64: 128, 128>}, {pipeline_mode = #tpu.pipeline_mode<synchronous>, transform_indices = @transform_4, window_bounds = array<i64: 128, 128>}, {pipeline_mode = #tpu.pipeline_mode<synchronous>, transform_indices = @transform_5, window_bounds = array<i64: 1, 128>}, {pipeline_mode = #tpu.pipeline_mode<synchronous>, transform_indices = @transform_6, window_bounds = array<i64: 1, 128>}, {pipeline_mode = #tpu.pipeline_mode<synchronous>, transform_indices = @transform_7, window_bounds = array<i64: 1, 128>}, {transform_indices = @transform_8, window_bounds = array<i64: 3>}, {transform_indices = @transform_9, window_bounds = array<i64: 1, 4, 8, 128>}]} {
    %c0 = arith.constant 0 : index
    %0 = memref.load %arg10[%c0] : memref<3xf32, #tpu.memory_space<smem>>
    %c1 = arith.constant 1 : index
    %1 = memref.load %arg10[%c1] : memref<3xf32, #tpu.memory_space<smem>>
    %c2 = arith.constant 2 : index
    %2 = memref.load %arg10[%c2] : memref<3xf32, #tpu.memory_space<smem>>
    %c0_0 = arith.constant 0 : index
    %c0_1 = arith.constant 0 : index
    %c0_2 = arith.constant 0 : index
    %c0_3 = arith.constant 0 : index
    %3 = vector.load %arg2[%c0_0, %c0_1, %c0_2, %c0_3] : memref<1x4x8x128xf32, #tpu.memory_space<vmem>>, vector<1x4x8x128xf32>
    %4 = vector.shape_cast %3 : vector<1x4x8x128xf32> to vector<32x128xf32>
    %c0_4 = arith.constant 0 : index
    %c0_5 = arith.constant 0 : index
    %5 = vector.load %arg3[%c0_4, %c0_5] : memref<128x128xf32, #tpu.memory_space<vmem>>, vector<128x128xf32>
    %cst = arith.constant dense<0.000000e+00> : vector<32x128xf32>
    %6 = tpu.matmul %4, %5, %cst {dimension_numbers = #tpu.dot_dimension_numbers<[1], [0], [0], [1], [0, 0, 1, 1], [], []>} : vector<32x128xf32>, vector<128x128xf32>, vector<32x128xf32> -> vector<32x128xf32>
    %c0_6 = arith.constant 0 : index
    %c0_7 = arith.constant 0 : index
    %7 = vector.load %arg7[%c0_6, %c0_7] : memref<1x128xf32, #tpu.memory_space<vmem>>, vector<1x128xf32>
    %8 = vector.broadcast %7 : vector<1x128xf32> to vector<32x128xf32>
    %9 = arith.addf %6, %8 : vector<32x128xf32>
    %cst_8 = arith.constant 0.000000e+00 : f32
    %10 = vector.broadcast %cst_8 : f32 to vector<32x128xf32>
    %11 = arith.cmpf oge, %9, %10 : vector<32x128xf32>
    %12 = vector.broadcast %0 : f32 to vector<32x128xf32>
    %13 = arith.mulf %12, %9 : vector<32x128xf32>
    %14 = arith.select %11, %9, %13 : vector<32x128xi1>, vector<32x128xf32>
    %15 = vector.shape_cast %14 : vector<32x128xf32> to vector<1x4x8x128xf32>
    %cst_9 = arith.constant dense<0.000000e+00> : vector<1x8x128xf32>
    %16 = vector.multi_reduction <add>, %15, %cst_9 [1] : vector<1x4x8x128xf32> to vector<1x8x128xf32>
    %17 = vector.shape_cast %16 : vector<1x8x128xf32> to vector<8x128xf32>
    %c0_10 = arith.constant 0 : index
    %c0_11 = arith.constant 0 : index
    %18 = vector.load %arg4[%c0_10, %c0_11] : memref<128x128xf32, #tpu.memory_space<vmem>>, vector<128x128xf32>
    %cst_12 = arith.constant dense<0.000000e+00> : vector<8x128xf32>
    %19 = tpu.matmul %17, %18, %cst_12 {dimension_numbers = #tpu.dot_dimension_numbers<[1], [0], [0], [1], [0, 0, 1, 1], [], []>} : vector<8x128xf32>, vector<128x128xf32>, vector<8x128xf32> -> vector<8x128xf32>
    %c0_13 = arith.constant 0 : index
    %c0_14 = arith.constant 0 : index
    %20 = vector.load %arg8[%c0_13, %c0_14] : memref<1x128xf32, #tpu.memory_space<vmem>>, vector<1x128xf32>
    %21 = vector.broadcast %20 : vector<1x128xf32> to vector<8x128xf32>
    %22 = arith.addf %19, %21 : vector<8x128xf32>
    %cst_15 = arith.constant 0.000000e+00 : f32
    %23 = vector.broadcast %cst_15 : f32 to vector<8x128xf32>
    %24 = arith.cmpf oge, %22, %23 : vector<8x128xf32>
    %25 = vector.broadcast %1 : f32 to vector<8x128xf32>
    %26 = arith.mulf %25, %22 : vector<8x128xf32>
    %27 = arith.select %24, %22, %26 : vector<8x128xi1>, vector<8x128xf32>
    %c0_16 = arith.constant 0 : index
    %c0_17 = arith.constant 0 : index
    %28 = vector.load %arg5[%c0_16, %c0_17] : memref<128x128xf32, #tpu.memory_space<vmem>>, vector<128x128xf32>
    %cst_18 = arith.constant dense<0.000000e+00> : vector<32x128xf32>
    %29 = tpu.matmul %14, %28, %cst_18 {dimension_numbers = #tpu.dot_dimension_numbers<[1], [0], [0], [1], [0, 0, 1, 1], [], []>} : vector<32x128xf32>, vector<128x128xf32>, vector<32x128xf32> -> vector<32x128xf32>
    %c0_19 = arith.constant 0 : index
    %c0_20 = arith.constant 0 : index
    %30 = vector.load %arg6[%c0_19, %c0_20] : memref<128x128xf32, #tpu.memory_space<vmem>>, vector<128x128xf32>
    %cst_21 = arith.constant dense<0.000000e+00> : vector<8x128xf32>
    %31 = tpu.matmul %27, %30, %cst_21 {dimension_numbers = #tpu.dot_dimension_numbers<[1], [0], [0], [1], [0, 0, 1, 1], [], []>} : vector<8x128xf32>, vector<128x128xf32>, vector<8x128xf32> -> vector<8x128xf32>
    %c0_22 = arith.constant 0 : index
    %c0_23 = arith.constant 0 : index
    %32 = vector.load %arg9[%c0_22, %c0_23] : memref<1x128xf32, #tpu.memory_space<vmem>>, vector<1x128xf32>
    %33 = vector.broadcast %32 : vector<1x128xf32> to vector<8x128xf32>
    %34 = arith.addf %31, %33 : vector<8x128xf32>
    %35 = vector.shape_cast %29 : vector<32x128xf32> to vector<1x4x8x128xf32>
    %36 = vector.shape_cast %34 : vector<8x128xf32> to vector<1x1x8x128xf32>
    %37 = vector.broadcast %36 : vector<1x1x8x128xf32> to vector<1x4x8x128xf32>
    %38 = arith.addf %35, %37 : vector<1x4x8x128xf32>
    %cst_24 = arith.constant 0.000000e+00 : f32
    %39 = vector.broadcast %cst_24 : f32 to vector<1x4x8x128xf32>
    %40 = arith.cmpf oge, %38, %39 : vector<1x4x8x128xf32>
    %41 = vector.broadcast %2 : f32 to vector<1x4x8x128xf32>
    %42 = arith.mulf %41, %38 : vector<1x4x8x128xf32>
    %43 = arith.select %40, %38, %42 : vector<1x4x8x128xi1>, vector<1x4x8x128xf32>
    %44 = arith.addf %3, %43 : vector<1x4x8x128xf32>
    %c0_25 = arith.constant 0 : index
    %c0_26 = arith.constant 0 : index
    %c0_27 = arith.constant 0 : index
    %c0_28 = arith.constant 0 : index
    %45 = vector.load %arg11[%c0_25, %c0_26, %c0_27, %c0_28] : memref<1x4x8x128xf32, #tpu.memory_space<vmem>>, vector<1x4x8x128xf32>
    tpu.vector_store %arg11[%c0_25, %c0_26, %c0_27, %c0_28], %44 {strides = array<i32>} : memref<1x4x8x128xf32, #tpu.memory_space<vmem>>, vector<1x4x8x128xf32>,
    return
  }
  func.func @transform_0(%arg0: i32, %arg1: i32) -> (i32, i32, i32, i32) {
    %c0_i32 = arith.constant 0 : i32
    %c0_i32_0 = arith.constant 0 : i32
    %c0_i32_1 = arith.constant 0 : i32
    return %arg0, %c0_i32, %arg1, %c0_i32_0 : i32, i32, i32, i32
  }
  func.func @transform_1(%arg0: i32, %arg1: i32) -> (i32, i32) {
    %c0_i32 = arith.constant 0 : i32
    %c0_i32_0 = arith.constant 0 : i32
    %c0_i32_1 = arith.constant 0 : i32
    return %c0_i32, %c0_i32_0 : i32, i32
  }
  func.func @transform_2(%arg0: i32, %arg1: i32) -> (i32, i32) {
    %c0_i32 = arith.constant 0 : i32
    %c0_i32_0 = arith.constant 0 : i32
    %c0_i32_1 = arith.constant 0 : i32
    return %c0_i32, %c0_i32_0 : i32, i32
  }
  func.func @transform_3(%arg0: i32, %arg1: i32) -> (i32, i32) {
    %c0_i32 = arith.constant 0 : i32
    %c0_i32_0 = arith.constant 0 : i32
    %c0_i32_1 = arith.constant 0 : i32
    return %c0_i32, %c0_i32_0 : i32, i32
  }
  func.func @transform_4(%arg0: i32, %arg1: i32) -> (i32, i32) {
    %c0_i32 = arith.constant 0 : i32
    %c0_i32_0 = arith.constant 0 : i32
    %c0_i32_1 = arith.constant 0 : i32
    return %c0_i32, %c0_i32_0 : i32, i32
  }
  func.func @transform_5(%arg0: i32, %arg1: i32) -> (i32, i32) {
    %c0_i32 = arith.constant 0 : i32
    %c0_i32_0 = arith.constant 0 : i32
    %c0_i32_1 = arith.constant 0 : i32
    return %c0_i32, %c0_i32_0 : i32, i32
  }
  func.func @transform_6(%arg0: i32, %arg1: i32) -> (i32, i32) {
    %c0_i32 = arith.constant 0 : i32
    %c0_i32_0 = arith.constant 0 : i32
    %c0_i32_1 = arith.constant 0 : i32
    return %c0_i32, %c0_i32_0 : i32, i32
  }
  func.func @transform_7(%arg0: i32, %arg1: i32) -> (i32, i32) {
    %c0_i32 = arith.constant 0 : i32
    %c0_i32_0 = arith.constant 0 : i32
    %c0_i32_1 = arith.constant 0 : i32
    return %c0_i32, %c0_i32_0 : i32, i32
  }
  func.func @transform_8(%arg0: i32, %arg1: i32) -> i32 {
    %c0_i32 = arith.constant 0 : i32
    %c0_i32_0 = arith.constant 0 : i32
    return %c0_i32 : i32
  }
  func.func @transform_9(%arg0: i32, %arg1: i32) -> (i32, i32, i32, i32) {
    %c0_i32 = arith.constant 0 : i32
    %c0_i32_0 = arith.constant 0 : i32
    %c0_i32_1 = arith.constant 0 : i32
    return %arg0, %c0_i32, %arg1, %c0_i32_0 : i32, i32, i32, i32
  }
}

</mosaic_0001>

<bundles_post_ra>
// kernel: tpu_custom_call.1
= control target key start
LH: loop header
LB: loop body
LE: loop exit
PB: predicated region body
PF: predicated region fallthrough
CT: control target
= control target key end

     0   :  { %s2217_s0 = inlined_call_operand.hbm [shape: f32[2,4,8,128], index: 0, kind: input, shape index: {}]   ;;  %s2218_s1 = inlined_call_operand.hbm [shape: f32[128,128], index: 1, kind: input, shape index: {}]   ;;  %s2219_s2 = inlined_call_operand.hbm [shape: f32[128,128], index: 2, kind: input, shape index: {}]   ;;  %s2220_s3 = inlined_call_operand.hbm [shape: f32[128,128], index: 3, kind: input, shape index: {}]   ;;  %s2221_s4 = inlined_call_operand.hbm [shape: f32[128,128], index: 4, kind: input, shape index: {}]   ;;  %s2222_s5 = inlined_call_operand.vmem [shape: f32[1,128], index: 5, kind: input, shape index: {}]   ;;  %s2223_s6 = inlined_call_operand.vmem [shape: f32[1,128], index: 6, kind: input, shape index: {}]   ;;  %s2224_s7 = inlined_call_operand.vmem [shape: f32[1,128], index: 7, kind: input, shape index: {}]   ;;  %s2225_s8 = inlined_call_operand.vmem [shape: f32[3], index: 8, kind: input, shape index: {}]   ;;  %s2226_s9 = inlined_call_operand.hbm [shape: f32[2,4,8,128], index: 9, kind: output, shape index: {}]  }
   0x1   :  { %2234 = sst [smem:[#allocation20_spill]] %s2218_s1 }
   0x2   :  { %2235 = sst [smem:[#allocation21_spill]] %s2224_s7 }
   0x3   :  { %2236 = sst [smem:[#allocation22_spill]] %s2226_s9 }
   0x4   :  { %14 = vsyncpa [#allocation3], 0 }
   0x5   :  { %16 = vsyncpa [#allocation3 + $0x1], 0 }
   0x6   :  { %17 = vsyncpa [#allocation7], 0 }
   0x7   :  { %18 = vsyncpa [#allocation10], 0 }
   0x8   :  { %19 = vsyncpa [#allocation5], 0 }
   0x9   :  { %20 = vsyncpa [#allocation4], 0 }
   0xa   :  { %22 = vsyncpa [#allocation4 + $0x1], 0  ;;  %s1838_s30 = smov 0   ;;  %s1840_s10 = smov 0  }
   0xb   :  { %s1842_s11 = smov 0   ;;  %s1844_s12 = smov 0  }
   0xc   :  { %s1846_s13 = smov 0   ;;  %s1848_s14 = smov 0  }
   0xd LB: > { %2237 = sst [smem:[#allocation19_spill]] %s1764_s12  ;;  %s2227_s15 = sadd.s32 4294967295, %s1772_s14   ;;  %s1772_s14 = sphi %s1848_s14, %s28_s14   ;;  %s1768_s13 = sphi %s1846_s13, %s2264_s13   ;;  %s1764_s12 = sphi %s1844_s12, %s2263_s12   ;;  %s1760_s11 = sphi %s1842_s11, %s2262_s11   ;;  %s1756_s10 = sphi %s1840_s10, %s2261_s10   ;;  %s1752_s30 = sphi %s1838_s30, %s2260_s30  }
   0xe   : > { %p1039_p0 = scmp.ge.s32.totalorder %s1772_s14, 1  ;;  %p1872_p1 = scmp.eq.s32.totalorder %s2227_s15, 0 }
   0xf   : > { %p269_p2 = scmp.lt.s32.totalorder %s1772_s14, 3  ;;  %s1774_s18 = smov [#allocation6]  }
  0x10   : > { %s2238_s16 = scalar_select %p1872_p1, 1, 0 }
  0x11   : > { %p1877_p3 = pnand %p1039_p0, %p269_p2  ;;  %s281_s19 = sshll.u32 %s1774_s18, 4  ;;  %s1881_s19 = int_to_ptr.vmem [resolvable:$true] %s281_s19 }
  0x12   : > { %s1775_s21 = smov [#allocation9]   ;;  %s1776_s23 = smov [#allocation8]  }
  0x13   : > { %s2239_s17 = scalar_select %p1877_p3, 1, 0 }
  0x14   : > { %p1425_p4 = pneg %p1877_p3  ;;  %s307_s22 = sshll.u32 %s1775_s21, 4  ;;  %s1892_s22 = int_to_ptr.vmem [resolvable:$true] %s307_s22 }
  0x15   : > { %s1894_s24 = sshll.u32 %s1776_s23, 4  ;;  %s2241_s1 = sld [smem:[#allocation20_spill]]  ;;  %s295_s24 = int_to_ptr.vmem [resolvable:$true] %s1894_s24 }
  0x16   : > { %p1888_p6 = pnand %p1425_p4, %p1872_p1 }
  0x18   : > { %p1904_p8 = pneg %p1888_p6 }
  0x1b   : > { %s1521_s27 = scalar_lea.hbm %s2241_s1, 2048 }
  0x1c   : > { %p1522_p7 = scmp.ne.s32.totalorder %s2241_s1, %s1521_s27  ;;  %p1528_p11 = scmp.lt.u32.totalorder %s1521_s27, %s2241_s1 }
  0x1e   : > { %p1524_p9 = pnand %p1904_p8, %p1522_p7 }
  0x20   : > { %p1525_p10 = pneg %p1524_p9 }
  0x22   : > { %p1530_p12 = pnand %p1528_p11, %p1525_p10 }
  0x24   : > { %1533 = shalt.err (!%p1530_p12)
}
  0x25   : > { %s1534_s25 = scalar_lea.vmem %s1881_s19, 2048  ;;  %p1542_p4 = scmp.lt.s32.totalorder %s1881_s19, %s1881_s19 }
  0x26   : > { %p1535_p13 = scmp.ne.s32.totalorder %s1881_s19, %s1534_s25  ;;  %p1543_p5 = scmp.lt.s32.totalorder %s1534_s25, %s1534_s25 }
  0x28   : > { %p1537_p0 = pnand %p1535_p13, %p1904_p8  ;;  %p1544_p7 = por %p1543_p5, %p1542_p4 }
  0x2a   : > { %p1538_p2 = pneg %p1537_p0 }
  0x2c   : > { %p1545_p9 = pnand %p1544_p7, %p1538_p2 }
  0x2e   : > { %1548 = shalt.err (!%p1545_p9)
}
  0x2f   : > { %s2232_s26 = smov 128   ;;  %s1778_s27 = smov 8  }
  0x30   : > { %1428 = dma.hbm_to_vmem [thread:$0]  (!%p1888_p6), %s2241_s1, 2048, %s1881_s19, [#allocation7], %s2232_s26, %s2232_s26, %s1778_s27  }
  0x31   : > { %s1549_s25 = scalar_lea.hbm %s2220_s3, 2048 }
  0x32   : > { %p1550_p5 = scmp.ne.s32.totalorder %s2220_s3, %s1549_s25  ;;  %p1556_p12 = scmp.lt.u32.totalorder %s1549_s25, %s2220_s3 }
  0x34   : > { %p1552_p10 = pnand %p1550_p5, %p1904_p8 }
  0x36   : > { %p1553_p11 = pneg %p1552_p10 }
  0x38   : > { %p1558_p13 = pnand %p1556_p12, %p1553_p11 }
  0x3a   : > { %1561 = shalt.err (!%p1558_p13)
}
  0x3b   : > { %s1562_s19 = scalar_lea.vmem %s1892_s22, 2048  ;;  %p1570_p7 = scmp.lt.s32.totalorder %s1892_s22, %s1892_s22 }
  0x3c   : > { %p1563_p0 = scmp.ne.s32.totalorder %s1892_s22, %s1562_s19  ;;  %p1571_p9 = scmp.lt.s32.totalorder %s1562_s19, %s1562_s19 }
  0x3e   : > { %p1565_p2 = pnand %p1563_p0, %p1904_p8  ;;  %p1572_p5 = por %p1571_p9, %p1570_p7 }
  0x40   : > { %p1566_p4 = pneg %p1565_p2 }
  0x42   : > { %p1573_p10 = pnand %p1572_p5, %p1566_p4 }
  0x44   : > { %1576 = shalt.err (!%p1573_p10)
}
  0x45   : > { %1434 = dma.hbm_to_vmem [thread:$0]  (!%p1888_p6), %s2220_s3, 2048, %s1892_s22, [#allocation10], %s2232_s26, %s2232_s26, %s1778_s27  }
  0x46   : > { %s1577_s28 = scalar_lea.hbm %s2219_s2, 2048 }
  0x47   : > { %p1578_p11 = scmp.ne.s32.totalorder %s2219_s2, %s1577_s28  ;;  %p1584_p0 = scmp.lt.u32.totalorder %s1577_s28, %s2219_s2 }
  0x49   : > { %p1580_p12 = pnand %p1578_p11, %p1904_p8 }
  0x4b   : > { %p1581_p13 = pneg %p1580_p12 }
  0x4d   : > { %p1586_p2 = pnand %p1584_p0, %p1581_p13 }
  0x4f   : > { %1589 = shalt.err (!%p1586_p2)
}
  0x50   : > { %s1590_s19 = scalar_lea.vmem %s295_s24, 2048  ;;  %p1598_p5 = scmp.lt.s32.totalorder %s295_s24, %s295_s24 }
  0x51   : > { %p1591_p4 = scmp.ne.s32.totalorder %s295_s24, %s1590_s19  ;;  %p1599_p10 = scmp.lt.s32.totalorder %s1590_s19, %s1590_s19 }
  0x53   : > { %p1593_p7 = pnand %p1591_p4, %p1904_p8  ;;  %p1600_p3 = por %p1599_p10, %p1598_p5 }
  0x55   : > { %p1594_p9 = pneg %p1593_p7 }
  0x57   : > { %p1601_p1 = pnand %p1600_p3, %p1594_p9 }
  0x59   : > { %1604 = shalt.err (!%p1601_p1)
}
  0x5a   : > { %1431 = dma.hbm_to_vmem [thread:$0]  (!%p1888_p6), %s2219_s2, 2048, %s295_s24, [#allocation7], %s2232_s26, %s2232_s26, %s1778_s27  }
  0x5b   : > { %s1779_s9 = smov [#allocation11]   ;;  %s343_s29 = sshll.u32 %s2225_s8, 4  ;;  %s344_s29 = int_to_ptr.vmem [resolvable:$true] %s343_s29 }
  0x5c   : > { %s320_s12 = sshll.u32 %s1779_s9, 4  ;;  %s1605_s25 = scalar_lea.hbm %s2221_s4, 2048  ;;  %s321_s12 = int_to_ptr.vmem [resolvable:$true] %s320_s12 }
  0x5d   : > { %p1606_p1 = scmp.ne.s32.totalorder %s2221_s4, %s1605_s25  ;;  %p1612_p12 = scmp.lt.u32.totalorder %s1605_s25, %s2221_s4 }
  0x5f   : > { %p1608_p3 = pnand %p1606_p1, %p1904_p8 }
  0x61   : > { %p1609_p11 = pneg %p1608_p3 }
  0x63   : > { %p1614_p13 = pnand %p1612_p12, %p1609_p11 }
  0x65   : > { %1617 = shalt.err (!%p1614_p13)
}
  0x66   : > { %s1618_s7 = scalar_lea.vmem %s321_s12, 2048  ;;  %p1626_p7 = scmp.lt.s32.totalorder %s321_s12, %s321_s12 }
  0x67   : > { %p1619_p0 = scmp.ne.s32.totalorder %s321_s12, %s1618_s7  ;;  %p1627_p9 = scmp.lt.s32.totalorder %s1618_s7, %s1618_s7 }
  0x69   : > { %p1621_p2 = pnand %p1619_p0, %p1904_p8  ;;  %p1628_p5 = por %p1627_p9, %p1626_p7 }
  0x6b   : > { %p1622_p4 = pneg %p1621_p2 }
  0x6d   : > { %p1629_p10 = pnand %p1628_p5, %p1622_p4 }
  0x6f   : > { %1632 = shalt.err (!%p1629_p10)
}
  0x70   : > { %1437 = dma.hbm_to_vmem [thread:$0]  (!%p1888_p6), %s2221_s4, 2048, %s321_s12, [#allocation10], %s2232_s26, %s2232_s26, %s1778_s27  }
  0x71   : > { %s1633_s15 = scalar_lea.vmem %s344_s29, 16  ;;  %p1641_p12 = scmp.lt.s32.totalorder %s344_s29, %s344_s29 }
  0x72   : > { %p1634_p1 = scmp.ne.s32.totalorder %s344_s29, %s1633_s15  ;;  %p1642_p13 = scmp.lt.s32.totalorder %s1633_s15, %s1633_s15 }
  0x74   : > { %p1636_p3 = pnand %p1634_p1, %p1904_p8  ;;  %p1643_p0 = por %p1642_p13, %p1641_p12 }
  0x76   : > { %p1637_p11 = pneg %p1636_p3 }
  0x78   : > { %p1644_p2 = pnand %p1643_p0, %p1637_p11 }
  0x7a   : > { %1647 = shalt.err (!%p1644_p2)
}
  0x7b   : > { %s1780_s28 = smov [#allocation12]   ;;  %s1038_s18 = sadd.s32 4294967294, %s1772_s14  }
  0x7c   : > { %1440 = dma.vmem_to_smem (!%p1888_p6), %s344_s29, 16, %s1780_s28, [#allocation5]  }
  0x7d   : > { %s40_s12 = sadd.s32 1, %s1768_s13  ;;  %s49_s21 = sadd.s32 1, %s1760_s11 }
  0x7e   : > { %p42_p8 = scmp.ge.s32.totalorder %s40_s12, 2  ;;  %p56_p4 = scmp.ne.s32.totalorder %s1760_s11, %s1756_s10 }
  0x7f   : > { %p57_p7 = scmp.eq.s32.totalorder %s1772_s14, 0  ;;  %p62_p9 = scmp.ne.s32.totalorder %s1756_s10, %s1752_s30 }
  0x80   : > { %s2266_s12 = smov (%p42_p8, %s40_s12), 0  ;;  %p2244_p10 = scmp.ne.s32.totalorder %s2238_s16, 0 }
  0x81   : > { %p2014_p5 = por %p57_p7, %p56_p4  ;;  %s44_s23 = ssub.s32 %s1768_s13, %s2266_s12 }
  0x82   : > { %p2020_p6 = por %p2244_p10, %p62_p9  ;;  %s2246_s25 = sadd.s32 4294967295, %s1772_s14  }
  0x83   : > { %p256_p1 = scmp.eq.s32.totalorder %s2246_s25, 1  ;;  %p47_p3 = scmp.eq.s32.totalorder %s44_s23, 0 }
  0x84   : > { %p262_p11 = scmp.eq.s32.totalorder %s1038_s18, 1  ;;  %p1454_p13 = scmp.lt.s32.totalorder %s1772_s14, 2 }
  0x85   : > { %p2028_p12 = por %p256_p1, %p56_p4  ;;  %s354_s7 = sand.u32 1, %s1760_s11  }
  0x86   : > { %s2034_s24 = scalar_select %p47_p3, %s1760_s11, %s49_s21  }
  0x87   : > { %s2247_s19 = scalar_select %p2028_p12, 1, 0 }
  0x88   : > { %p2036_p0 = por %p262_p11, %p62_p9  ;;  %s1046_s1 = sshll.u32 %s354_s7, 5 }
  0x89   : > { %s1067_s9 = sshll.u32 %s1768_s13, 9  ;;  %s358_s18 = scalar_lea.vmem [#allocation2], %s1046_s1 }
  0x8a   : > { %s2248_s22 = scalar_select %p2036_p0, 1, 0 }
  0x8b   : > { %s2045_s25 = scalar_lea.hbm %s2217_s0, %s1067_s9  ;;  %s366_s23 = sshll.u32 %s358_s18, 4  ;;  %s2047_s23 = int_to_ptr.vmem [resolvable:$true] %s366_s23 }
  0x8c   : > { %p2051_p2 = pnand %p1454_p13, %p2014_p5  ;;  %s2055_s26 = scalar_lea.sflag [#allocation3], %s354_s7 }
  0x8d   : > { %s1648_s15 = scalar_lea.hbm %s2045_s25, 512  ;;  %s1653_s20 = scalar_lea.hbm %s2217_s0, 1024 }
  0x8e   : > { %p1649_p8 = scmp.ne.s32.totalorder %s2045_s25, %s1648_s15  ;;  %p1650_p4 = pneg %p2051_p2 }
  0x8f   : > { %p1654_p5 = scmp.lt.u32.totalorder %s2045_s25, %s2217_s0  ;;  %p1655_p10 = scmp.lt.u32.totalorder %s1653_s20, %s1648_s15 }
  0x90   : > { %p1651_p7 = pnand %p1650_p4, %p1649_p8  ;;  %p1657_p3 = scmp.lt.u32.totalorder %s1648_s15, %s2045_s25 }
  0x91   : > { %p1656_p1 = por %p1655_p10, %p1654_p5 }
  0x92   : > { %p1652_p9 = pneg %p1651_p7 }
  0x93   : > { %p1658_p11 = por %p1657_p3, %p1656_p1 }
  0x95   : > { %p1659_p13 = pnand %p1658_p11, %p1652_p9 }
  0x97   : > { %1662 = shalt.err (!%p1659_p13)
}
  0x98   : > { %s1663_s7 = scalar_lea.vmem %s2047_s23, 512  ;;  %s1781_s1 = smov [#allocation2]  }
  0x99   : > { %p1664_p8 = scmp.ne.s32.totalorder %s2047_s23, %s1663_s7  ;;  %s1668_s9 = sshll.u32 %s1781_s1, 4  ;;  %s1669_s9 = int_to_ptr.vmem [resolvable:$false] %s1668_s9 }
  0x9a   : > { %s1670_s28 = scalar_lea.vmem %s1669_s9, 1024  ;;  %p1671_p12 = scmp.lt.s32.totalorder %s2047_s23, %s1669_s9 }
  0x9b   : > { %p1666_p7 = pnand %p1664_p8, %p1650_p4  ;;  %p1672_p5 = scmp.lt.s32.totalorder %s1670_s28, %s1663_s7 }
  0x9d   : > { %p1667_p0 = pneg %p1666_p7  ;;  %p1673_p10 = por %p1672_p5, %p1671_p12 }
  0x9f   : > { %p1674_p1 = pnand %p1673_p10, %p1667_p0 }
  0xa1   : > { %1677 = shalt.err (!%p1674_p1)
}
  0xa2   : > { %s2250_s15 = smov 128   ;;  %p2251_p4 = scmp.ne.s32.totalorder %s2239_s17, 0 }
  0xa3   : > { %1444 = dma.hbm_to_vmem [thread:$0]  (!%p2051_p2), %s2045_s25, 512, %s2047_s23, %s2055_s26, %s2250_s15, %s2250_s15, %s1778_s27  }
  0xa4   : > { %378 = sbr.rel (%p2251_p4) target bundleno = 897 (0x381), region = 56  ;;  %s2089_s20 = sand.u32 (!%p2251_p4), 1, %s1756_s10  }
  0xa5   : > { %s1050_s18 = sshll.u32 (!%p2251_p4), %s2089_s20, 5  ;;  %s381_s7 = scalar_lea.sflag (!%p2251_p4), [#allocation3], %s2089_s20 }
  0xa6   : > { %s2095_s21 = scalar_lea.vmem (!%p2251_p4), [#allocation2], %s1050_s18 }
  0xab   : > { %1731 = dma.done.wait (%p2020_p6), %s381_s7, 512  }
  0xac   : > { %1733 = vsyncadd (%p2020_p6), %s381_s7, 4294966784  ;;  %p2252_p12 = scmp.ne.s32.totalorder %s2238_s16, 0 }
  0xae   : > { %1735 = dma.done.wait (%p2252_p12), [#allocation7], 4096  }
  0xaf   : > { %1737 = vsyncadd (%p2252_p12), [#allocation7], 4294963200 }
  0xb0   : > { %1739 = dma.done.wait (%p2252_p12), [#allocation10], 4096  }
  0xb1   : > { %1741 = vsyncadd (%p2252_p12), [#allocation10], 4294963200 }
  0xb2   : > { %1743 = dma.done.wait (%p2252_p12), [#allocation5], 16  }
  0xb3   : > { %1745 = vsyncadd (%p2252_p12), [#allocation5], 4294967280 }
  0xb4   : > { %409 = sfence }
  0xb5   : > { %v447_v0 = vld [vmem:[#allocation6] sm:$0xff]  ;;  %v448_v1 = vld [vmem:[#allocation6 + $0x8] sm:$0xff]  ;;  %v449_v2 = vld [vmem:[#allocation6 + $0x10] sm:$0xff]  ;;  %v1782_v5 = vmov 0.0|0.0   ;;  %vm1783_vm0 = vmmov 0   ;;  %s440_s16 = sld [smem:[#allocation12]] }
  0xb6   : > { %v1289_v3 = vpack.c.bf16 %v448_v1, %v447_v0  ;;  %v450_v4 = vld [vmem:[#allocation6 + $0x18] sm:$0xff]  ;;  %1321 = vmatprep.subr.bf16.mxu1 %v1782_v5  ;;  %v451_v7 = vld [vmem:[#allocation6 + $0x20] sm:$0xff]  ;;  %v452_v8 = vld [vmem:[#allocation6 + $0x28] sm:$0xff]  ;;  %s1057_s27 = sld [smem:[#allocation12 + $0x1]]  ;;  %s2253_s23 = sld [smem:[#allocation19_spill]] }
  0xb7   : > { %v1293_v6 = vpack.c.bf16 %v450_v4, %v449_v2  ;;  %v1297_v9 = vpack.c.bf16 %v452_v8, %v451_v7  ;;  %v2115_v10 = vld [vmem:[%s2095_s21] sm:$0xff]  ;;  %v453_v11 = vld [vmem:[#allocation6 + $0x30] sm:$0xff]  ;;  %v454_v12 = vld [vmem:[#allocation6 + $0x38] sm:$0xff]  ;;  %s1058_s1 = sld [smem:[#allocation12 + $0x2]]  ;;  %s2254_s15 = sld [smem:[#allocation21_spill]] }
  0xb8   : > { %1290 = vmatprep.subr.bf16.mxu0 %v1289_v3  ;;  %1175 = vmatprep.mubr.f32.mxu0 %v2115_v10  ;;  %v571_v13 = vld [vmem:[#allocation8] sm:$0xff]  ;;  %v572_v14 = vld [vmem:[#allocation8 + $0x8] sm:$0xff]  ;;  %v1301_v15 = vpack.c.bf16 %v454_v12, %v453_v11  ;;  %v573_v17 = vld [vmem:[#allocation8 + $0x10] sm:$0xff]  ;;  %p2256_p0 = scmp.ne.s32.totalorder %s2247_s19, 0 }
  0xb9   : > { %1292 = vmatpush3.bf16.msra.mxu0 %v1289_v3  ;;  %v1322_v16 = vpack.c.bf16 %v572_v14, %v571_v13  ;;  %v574_v18 = vld [vmem:[#allocation8 + $0x18] sm:$0xff]  ;;  %v455_v19 = vld [vmem:[#allocation6 + $0x40] sm:$0xff]  ;;  %v456_v20 = vld [vmem:[#allocation6 + $0x48] sm:$0xff] }
  0xba   : > { %1294 = vmatprep.subr.bf16.mxu0 %v1293_v6  ;;  %v1325_v21 = vpack.c.bf16 %v574_v18, %v573_v17  ;;  %v575_v22 = vld [vmem:[#allocation8 + $0x20] sm:$0xff]  ;;  %v576_v23 = vld [vmem:[#allocation8 + $0x28] sm:$0xff]  ;;  %v1305_v24 = vpack.c.bf16 %v456_v20, %v455_v19  ;;  %v457_v25 = vld [vmem:[#allocation6 + $0x50] sm:$0xff] }
  0xbb   : > { %1323 = vmatpush3.bf16.msra.mxu1 %v1322_v16  ;;  %v458_v26 = vld [vmem:[#allocation6 + $0x58] sm:$0xff]  ;;  %v1328_v27 = vpack.c.bf16 %v576_v23, %v575_v22  ;;  %v577_v28 = vld [vmem:[#allocation8 + $0x30] sm:$0xff]  ;;  %v459_v31 = vld [vmem:[#allocation6 + $0x60] sm:$0xff]  ;;  %v559_v18 = vstv %s440_s16 }
  0xbc   : > { %1324 = vmatprep.subr.bf16.mxu1 %v1782_v5  ;;  %v578_v29 = vld [vmem:[#allocation8 + $0x38] sm:$0xff]  ;;  %v1309_v30 = vpack.c.bf16 %v458_v26, %v457_v25  ;;  %v460_v32 = vld [vmem:[#allocation6 + $0x68] sm:$0xff]  ;;  %v461_v35 = vld [vmem:[#allocation6 + $0x70] sm:$0xff]  ;;  %s1068_s7 = sshll.u32 %s2253_s23, 9  ;;  %s1785_s23 = smov [#allocation13]  }
  0xbd   : > { %1296 = vmatpush3.bf16.msra.mxu0 %v1293_v6  ;;  %v1331_v33 = vpack.c.bf16 %v578_v29, %v577_v28  ;;  %v1313_v34 = vpack.c.bf16 %v460_v32, %v459_v31  ;;  %v462_v36 = vld [vmem:[#allocation6 + $0x78] sm:$0xff]  ;;  %v668_v38 = vld [vmem:[#allocation9] sm:$0xff]  ;;  %v669_v39 = vld [vmem:[#allocation9 + $0x8] sm:$0xff] }
  0xbe   : > { %1298 = vmatprep.subr.bf16.mxu0 %v1297_v9  ;;  %v1317_v37 = vpack.c.bf16 %v462_v36, %v461_v35  ;;  %v1345_v40 = vpack.c.bf16 %v669_v39, %v668_v38  ;;  %v670_v41 = vld [vmem:[#allocation9 + $0x10] sm:$0xff]  ;;  %v671_v42 = vld [vmem:[#allocation9 + $0x18] sm:$0xff]  ;;  %v2123_v43 = vld [vmem:[%s2095_s21 + $0x8] sm:$0xff] }
  0xbf   : > { %1326 = vmatpush3.bf16.msra.mxu1 %v1325_v21  ;;  %v2126_v44 = vld [vmem:[%s2095_s21 + $0x10] sm:$0xff]  ;;  %v1349_v45 = vpack.c.bf16 %v671_v42, %v670_v41  ;;  %v672_v46 = vld [vmem:[#allocation9 + $0x20] sm:$0xff]  ;;  %v673_v47 = vld [vmem:[#allocation9 + $0x28] sm:$0xff] }
  0xc0   : > { %1327 = vmatprep.subr.bf16.mxu1 %v1782_v5  ;;  %v2131_v48 = vld [vmem:[%s2095_s21 + $0x18] sm:$0xff]  ;;  %v1353_v49 = vpack.c.bf16 %v673_v47, %v672_v46  ;;  %v674_v50 = vld [vmem:[#allocation9 + $0x30] sm:$0xff]  ;;  %v676_v53 = vld [vmem:[#allocation9 + $0x40] sm:$0xff]  ;;  %s439_s21 = scalar_lea.vmem [#allocation13], %s1050_s18  ;;  %s888_s18 = scalar_lea.sflag [#allocation4], %s2089_s20 }
  0xc1   : > { %1300 = vmatpush3.bf16.msra.mxu0 %v1297_v9  ;;  %v675_v51 = vld [vmem:[#allocation9 + $0x38] sm:$0xff]  ;;  %v677_v54 = vld [vmem:[#allocation9 + $0x48] sm:$0xff]  ;;  %v678_v56 = vld [vmem:[#allocation9 + $0x50] sm:$0xff]  ;;  %s902_s16 = sshll.u32 %s439_s21, 4  ;;  %s2164_s16 = int_to_ptr.vmem [resolvable:$true] %s902_s16 }
  0xc2   : > { %1302 = vmatprep.subr.bf16.mxu0 %v1301_v15  ;;  %v1357_v52 = vpack.c.bf16 %v675_v51, %v674_v50  ;;  %v1361_v55 = vpack.c.bf16 %v677_v54, %v676_v53  ;;  %v679_v57 = vld [vmem:[#allocation9 + $0x58] sm:$0xff]  ;;  %v579_v59 = vld [vmem:[#allocation8 + $0x40] sm:$0xff]  ;;  %v580_v60 = vld [vmem:[#allocation8 + $0x48] sm:$0xff]  ;;  %s1678_s25 = scalar_lea.vmem %s2164_s16, 512 }
  0xc3   : > { %1329 = vmatpush3.bf16.msra.mxu1 %v1328_v27  ;;  %v1365_v58 = vpack.c.bf16 %v679_v57, %v678_v56  ;;  %v680_v61 = vld [vmem:[#allocation9 + $0x60] sm:$0xff]  ;;  %v1334_v62 = vpack.c.bf16 %v580_v60, %v579_v59  ;;  %v681_v63 = vld [vmem:[#allocation9 + $0x68] sm:$0xff]  ;;  %v581_v1 = vld [vmem:[#allocation8 + $0x50] sm:$0xff]  ;;  %p1679_p6 = scmp.ne.s32.totalorder %s2164_s16, %s1678_s25 }
  0xc4   : > { %1330 = vmatprep.subr.bf16.mxu1 %v1782_v5  ;;  %v1369_v0 = vpack.c.bf16 %v681_v63, %v680_v61  ;;  %v582_v2 = vld [vmem:[#allocation8 + $0x58] sm:$0xff]  ;;  %v682_v3 = vld [vmem:[#allocation9 + $0x70] sm:$0xff]  ;;  %v583_v8 = vld [vmem:[#allocation8 + $0x60] sm:$0xff] }
  0xc5   : > { %1304 = vmatpush3.bf16.msra.mxu0 %v1301_v15  ;;  %v1337_v4 = vpack.c.bf16 %v582_v2, %v581_v1  ;;  %v683_v6 = vld [vmem:[#allocation9 + $0x78] sm:$0xff]  ;;  %v584_v9 = vld [vmem:[#allocation8 + $0x68] sm:$0xff]  ;;  %v585_v12 = vld [vmem:[#allocation8 + $0x70] sm:$0xff]  ;;  %v1784_v15 = vmov 0.0   ;;  %p1680_p2 = pnand %p1679_p6, %p2256_p0 }
  0xc6   : > { %1306 = vmatprep.subr.bf16.mxu0 %v1305_v24  ;;  %v1373_v7 = vpack.c.bf16 %v683_v6, %v682_v3  ;;  %v1340_v11 = vpack.c.bf16 %v584_v9, %v583_v8  ;;  %v586_v13 = vld [vmem:[#allocation8 + $0x78] sm:$0xff]  ;;  %1213 = vmatprep.mubr.msk.f32.mxu1 %vm1783_vm0, %v1784_v15  ;;  %v1059_v16 = vld [vmem:[%s2222_s5] ss:$0 sm:$0xff]  ;;  %v774_v46 = vld [vmem:[#allocation11 + $0x28] sm:$0xff] }
  0xc7   : > { %1332 = vmatpush3.bf16.msra.mxu1 %v1331_v33  ;;  %v1343_v14 = vpack.c.bf16 %v586_v13, %v585_v12  ;;  %v769_v33 = vld [vmem:[#allocation11] sm:$0xff]  ;;  %v772_v41 = vld [vmem:[#allocation11 + $0x18] sm:$0xff]  ;;  %v778_v53 = vld [vmem:[#allocation11 + $0x48] sm:$0xff]  ;;  %p1681_p9 = pneg %p1680_p2 }
  0xc8   : > { %1333 = vmatprep.subr.bf16.mxu1 %v1782_v5  ;;  %v776_v50 = vld [vmem:[#allocation11 + $0x38] sm:$0xff]  ;;  %v782_v59 = vld [vmem:[#allocation11 + $0x68] sm:$0xff]  ;;  %v783_v61 = vld [vmem:[#allocation11 + $0x70] sm:$0xff] }
  0xc9   : > { %1308 = vmatpush3.bf16.msra.mxu0 %v1305_v24  ;;  %v780_v56 = vld [vmem:[#allocation11 + $0x58] sm:$0xff]  ;;  %v1061_v12 = vld [vmem:[%s2254_s15] ss:$0 sm:$0xff] }
  0xca   : > { %1310 = vmatprep.subr.bf16.mxu0 %v1309_v30 }
  0xcb   : > { %1335 = vmatpush3.bf16.msra.mxu1 %v1334_v62  ;;  %v784_v62 = vld [vmem:[#allocation11 + $0x78] sm:$0xff] }
  0xcc   : > { %1336 = vmatprep.subr.bf16.mxu1 %v1782_v5  ;;  %v1399_v63 = vpack.c.bf16 %v784_v62, %v783_v61 }
  0xcd   : > { %1312 = vmatpush3.bf16.msra.mxu0 %v1309_v30 }
  0xce   : > { %1314 = vmatprep.subr.bf16.mxu0 %v1313_v34 }
  0xcf   : > { %1338 = vmatpush3.bf16.msra.mxu1 %v1337_v4  ;;  %v1060_v4 = vld [vmem:[%s2223_s6] ss:$0 sm:$0xff] }
  0xd0   : > { %1339 = vmatprep.subr.bf16.mxu1 %v1782_v5 }
  0xd1   : > { %1316 = vmatpush3.bf16.msra.mxu0 %v1313_v34  ;;  %v770_v34 = vld [vmem:[#allocation11 + $0x8] sm:$0xff] }
  0xd2   : > { %1318 = vmatprep.subr.bf16.mxu0 %v1317_v37  ;;  %v1378_v38 = vpack.c.bf16 %v770_v34, %v769_v33 }
  0xd3   : > { %1341 = vmatpush3.bf16.msra.mxu1 %v1340_v11 }
  0xd4   : > { %1342 = vmatprep.subr.bf16.mxu1 %v1782_v5 }
  0xd5   : > { %1320 = vmatpush3.bf16.msra.mxu0 %v1317_v37 }
  0xd6   : > { %1346 = vmatprep.subr.bf16.mxu0 %v1345_v40 }
  0xd7   : > { %1344 = vmatpush3.bf16.msra.mxu1 %v1343_v14 }
  0xd8   : > { %1176 = vmatmul.mubr.f32.vlgmr.msra.gmra.mrb[0].mxu0 %v2123_v43  ;;  %1377 = vmatprep.subr.bf16.mxu1 %v1782_v5 }
  0xd9   : > { %1178 = vmatprep.mubr.f32.mxu0 %v2126_v44  ;;  %1348 = vmatpush3.bf16.msra.mxu0 %v1345_v40  ;;  %v771_v40 = vld [vmem:[#allocation11 + $0x10] sm:$0xff] }
  0xda   : > { %1350 = vmatprep.subr.bf16.mxu0 %v1349_v45  ;;  %v1381_v42 = vpack.c.bf16 %v772_v41, %v771_v40 }
  0xdc   : > { %1179 = vmatmul.mubr.f32.gmra.mrb[2].mxu0 %v2131_v48 }
  0xdd   : > { %1352 = vmatpush3.bf16.msra.mxu0 %v1349_v45  ;;  %v773_v45 = vld [vmem:[#allocation11 + $0x20] sm:$0xff] }
  0xde   : > { %1354 = vmatprep.subr.bf16.mxu0 %v1353_v49  ;;  %v1384_v47 = vpack.c.bf16 %v774_v46, %v773_v45 }
  0xe1   : > { %1356 = vmatpush3.bf16.msra.mxu0 %v1353_v49  ;;  %v775_v49 = vld [vmem:[#allocation11 + $0x30] sm:$0xff] }
  0xe2   : > { %1358 = vmatprep.subr.bf16.mxu0 %v1357_v52  ;;  %v1387_v51 = vpack.c.bf16 %v776_v50, %v775_v49 }
  0xe5   : > { %1360 = vmatpush3.bf16.msra.mxu0 %v1357_v52  ;;  %v777_v52 = vld [vmem:[#allocation11 + $0x40] sm:$0xff] }
  0xe6   : > { %1362 = vmatprep.subr.bf16.mxu0 %v1361_v55  ;;  %v1390_v54 = vpack.c.bf16 %v778_v53, %v777_v52 }
  0xe9   : > { %1364 = vmatpush3.bf16.msra.mxu0 %v1361_v55  ;;  %v779_v55 = vld [vmem:[#allocation11 + $0x50] sm:$0xff] }
  0xea   : > { %1366 = vmatprep.subr.bf16.mxu0 %v1365_v58  ;;  %v1393_v57 = vpack.c.bf16 %v780_v56, %v779_v55 }
  0xed   : > { %1368 = vmatpush3.bf16.msra.mxu0 %v1365_v58  ;;  %v781_v58 = vld [vmem:[#allocation11 + $0x60] sm:$0xff] }
  0xee   : > { %1370 = vmatprep.subr.bf16.mxu0 %v1369_v0  ;;  %v1396_v60 = vpack.c.bf16 %v782_v59, %v781_v58 }
  0xf1   : > { %1372 = vmatpush3.bf16.msra.mxu0 %v1369_v0 }
  0xf2   : > { %1374 = vmatprep.subr.bf16.mxu0 %v1373_v7 }
  0xf5   : > { %1376 = vmatpush3.bf16.msra.mxu0 %v1373_v7  ;;  %v665_v7 = vstv %s1057_s27  ;;  %s2255_s27 = sld [smem:[#allocation22_spill]] }
  0xfb   : > { %s2162_s29 = scalar_lea.hbm %s2255_s27, %s1068_s7 }
 0x1ab   : > { %v1177_v17 = vpop.f32.mrb[0].mxu0 }
 0x1ac   : > { %v542_v19 = vadd.f32 %v1177_v17, %v1059_v16  ;;  %v536_v20 = vpop.f32.mrb[1].mxu0 }
 0x1ad   : > { %v537_v21 = vadd.f32 %v1059_v16, %v536_v20 }
 0x1ae   : > { %vm556_vm1 = vcmp.ge.f32.partialorder %v542_v19, 0.0  ;;  %v561_v22 = vmul.f32 %v559_v18, %v542_v19 }
 0x1af   : > { %v560_v23 = vmul.f32 %v559_v18, %v537_v21  ;;  %v1180_v24 = vpop.f32.mrb[2].mxu0  ;;  %vm555_vm2 = vcmp.ge.f32.partialorder %v537_v21, 0.0 }
 0x1b0   : > { %v552_v25 = vadd.f32 %v1180_v24, %v1059_v16  ;;  %v546_v26 = vpop.f32.mrb[3].mxu0  ;;  %v565_v27 = vsel %vm556_vm1, %v542_v19, %v561_v22 }
 0x1b1   : > { %v547_v28 = vadd.f32 %v1059_v16, %v546_v26  ;;  %v564_v29 = vsel %vm555_vm2, %v537_v21, %v560_v23  ;;  %v870_v16 = vstv %s1058_s1  ;;  %s1682_s1 = sshll.u32 %s1785_s23, 4  ;;  %s1683_s1 = int_to_ptr.vmem [resolvable:$false] %s1682_s1 }
 0x1b2   : > { %v563_v30 = vmul.f32 %v559_v18, %v552_v25  ;;  %v568_v31 = vadd.f32 %v565_v27, %v564_v29  ;;  %1248 = vmatprep.mubr.f32.mxu0 %v564_v29  ;;  %vm558_vm4 = vcmp.ge.f32.partialorder %v552_v25, 0.0  ;;  %s1684_s9 = scalar_lea.vmem %s1683_s1, 1024  ;;  %p1685_p3 = scmp.lt.s32.totalorder %s2164_s16, %s1683_s1 }
 0x1b3   : > { %v562_v32 = vmul.f32 %v559_v18, %v547_v28  ;;  %1249 = vmatmul.mubr.f32.vlgmr.msra.gmra.mrb[4].mxu0 %v565_v27  ;;  %vm557_vm3 = vcmp.ge.f32.partialorder %v547_v28, 0.0  ;;  %p1686_p11 = scmp.lt.s32.totalorder %s1684_s9, %s1678_s25 }
 0x1b4   : > { %v567_v37 = vsel %vm558_vm4, %v552_v25, %v563_v30 }
 0x1b5   : > { %v566_v35 = vsel %vm557_vm3, %v547_v28, %v562_v32  ;;  %p1687_p13 = por %p1686_p11, %p1685_p3 }
 0x1b6   : > { %v569_v36 = vadd.f32 %v568_v31, %v566_v35  ;;  %1251 = vmatprep.mubr.f32.mxu0 %v566_v35 }
 0x1b7   : > { %1252 = vmatmul.mubr.f32.gmra.mrb[6].mxu0 %v567_v37  ;;  %p1688_p8 = pnand %p1687_p13, %p1681_p9 }
 0x1b8   : > { %v570_v39 = vadd.f32 %v569_v36, %v567_v37 }
 0x1ba   : > { %1214 = vmatmul.mubr.f32.vlgmr.msra.gmra.mrb[0].mxu1 %v570_v39 }
 0x1bb   : > { %1379 = vmatpush3.bf16.msra.mxu1 %v1378_v38  ;;  %1286 = vmatprep.mubr.msk.f32.mxu1 %vm1783_vm0, %v1784_v15 }
 0x1bc   : > { %1380 = vmatprep.subr.bf16.mxu1 %v1782_v5 }
 0x1bf   : > { %1382 = vmatpush3.bf16.msra.mxu1 %v1381_v42 }
 0x1c0   : > { %1383 = vmatprep.subr.bf16.mxu1 %v1782_v5 }
 0x1c3   : > { %1385 = vmatpush3.bf16.msra.mxu1 %v1384_v47 }
 0x1c4   : > { %1386 = vmatprep.subr.bf16.mxu1 %v1782_v5 }
 0x1c7   : > { %1388 = vmatpush3.bf16.msra.mxu1 %v1387_v51 }
 0x1c8   : > { %1389 = vmatprep.subr.bf16.mxu1 %v1782_v5 }
 0x1cb   : > { %1391 = vmatpush3.bf16.msra.mxu1 %v1390_v54 }
 0x1cc   : > { %1392 = vmatprep.subr.bf16.mxu1 %v1782_v5 }
 0x1cf   : > { %1394 = vmatpush3.bf16.msra.mxu1 %v1393_v57 }
 0x1d0   : > { %1395 = vmatprep.subr.bf16.mxu1 %v1782_v5 }
 0x1d3   : > { %1397 = vmatpush3.bf16.msra.mxu1 %v1396_v60 }
 0x1d4   : > { %1398 = vmatprep.subr.bf16.mxu1 %v1782_v5 }
 0x1d7   : > { %1400 = vmatpush3.bf16.msra.mxu1 %v1399_v63 }
 0x286   : > { %v1250_v0 = vpop.f32.mrb[4].mxu0 }
 0x287   : > { %v750_v1 = vpop.f32.mrb[5].mxu0 }
 0x28a   : > { %v1253_v2 = vpop.f32.mrb[6].mxu0 }
 0x28b   : > { %v760_v3 = vpop.f32.mrb[7].mxu0 }
 0x28d   : > { %v660_v6 = vpop.f32.mrb[0].mxu1 }
 0x28e   : > { %v661_v8 = vadd.f32 %v1060_v4, %v660_v6  ;;  %v1215_v9 = vpop.f32.mrb[1].mxu1 }
 0x290   : > { %vm664_vm5 = vcmp.ge.f32.partialorder %v661_v8, 0.0  ;;  %v666_v11 = vmul.f32 %v665_v7, %v661_v8 }
 0x292   : > { %v667_v5 = vsel %vm664_vm5, %v661_v8, %v666_v11 }
 0x293   : > { %1287 = vmatmul.mubr.f32.vlgmr.msra.gmra.mrb[2].mxu1 %v667_v5 }
 0x366   : > { %v858_v13 = vpop.f32.mrb[2].mxu1 }
 0x367   : > { %v859_v14 = vadd.f32 %v1061_v12, %v858_v13  ;;  %v1288_v15 = vpop.f32.mrb[3].mxu1 }
 0x369   : > { %v862_v17 = vadd.f32 %v859_v14, %v750_v1  ;;  %v863_v18 = vadd.f32 %v1250_v0, %v859_v14  ;;  %v864_v19 = vadd.f32 %v859_v14, %v760_v3  ;;  %v865_v20 = vadd.f32 %v1253_v2, %v859_v14 }
 0x36b   : > { %vm866_vm6 = vcmp.ge.f32.partialorder %v862_v17, 0.0  ;;  %vm867_vm7 = vcmp.ge.f32.partialorder %v863_v18, 0.0  ;;  %vm868_vm8 = vcmp.ge.f32.partialorder %v864_v19, 0.0  ;;  %vm869_vm9 = vcmp.ge.f32.partialorder %v865_v20, 0.0 }
 0x36c   : > { %v871_v21 = vmul.f32 %v870_v16, %v862_v17  ;;  %v872_v22 = vmul.f32 %v870_v16, %v863_v18  ;;  %v873_v23 = vmul.f32 %v870_v16, %v864_v19  ;;  %v874_v24 = vmul.f32 %v870_v16, %v865_v20 }
 0x36e   : > { %v875_v25 = vsel %vm866_vm6, %v862_v17, %v871_v21  ;;  %v876_v26 = vsel %vm867_vm7, %v863_v18, %v872_v22  ;;  %v877_v27 = vsel %vm868_vm8, %v864_v19, %v873_v23  ;;  %v878_v28 = vsel %vm869_vm9, %v865_v20, %v874_v24 }
 0x36f   : > { %v879_v29 = vadd.f32 %v875_v25, %v2115_v10  ;;  %v880_v30 = vadd.f32 %v876_v26, %v2123_v43  ;;  %v881_v31 = vadd.f32 %v877_v27, %v2126_v44  ;;  %v882_v32 = vadd.f32 %v878_v28, %v2131_v48 }
 0x371   : > { %883 = vst [vmem:[%s439_s21] sm:$0xff] %v879_v29  ;;  %884 = vst [vmem:[%s439_s21 + $0x8] sm:$0xff] %v880_v30 }
 0x372   : > { %885 = vst [vmem:[%s439_s21 + $0x10] sm:$0xff] %v881_v31  ;;  %886 = vst [vmem:[%s439_s21 + $0x18] sm:$0xff] %v882_v32 }
 0x373   : > { %1691 = shalt.err (!%p1688_p8)
}
 0x374   : > { %s1692_s28 = scalar_lea.hbm %s2162_s29, 512  ;;  %s1696_s21 = scalar_lea.hbm %s2255_s27, 1024 }
 0x375   : > { %p1693_p7 = scmp.ne.s32.totalorder %s2162_s29, %s1692_s28  ;;  %p1697_p1 = scmp.lt.u32.totalorder %s2162_s29, %s2255_s27 }
 0x376   : > { %p1698_p4 = scmp.lt.u32.totalorder %s1696_s21, %s1692_s28  ;;  %p1700_p6 = scmp.lt.u32.totalorder %s1692_s28, %s2162_s29 }
 0x377   : > { %p1694_p5 = pnand %p1693_p7, %p2256_p0 }
 0x378   : > { %p1699_p12 = por %p1698_p4, %p1697_p1 }
 0x379   : > { %p1695_p10 = pneg %p1694_p5 }
 0x37a   : > { %p1701_p2 = por %p1700_p6, %p1699_p12 }
 0x37c   : > { %p1702_p9 = pnand %p1701_p2, %p1695_p10 }
 0x37e   : > { %1705 = shalt.err (!%p1702_p9)
}
 0x37f   : > { %s1786_s25 = smov 128   ;;  %s1787_s23 = smov 8  }
 0x380   : > { %1423 = dma.vmem_to_hbm [thread:$0]  (%p2256_p0), %s2164_s16, 512, %s2162_s29, %s888_s18, %s1786_s25, %s1786_s25, %s1787_s23  }
 0x381 PF: > { %s917_s1 = sand.u32 1, %s1752_s30   ;;  %p2257_p3 = scmp.ne.s32.totalorder %s2248_s22, 0 }
 0x382   : > { %p2258_p11 = scmp.ge.s32.totalorder %s1772_s14, 2  ;;  %s918_s9 = scalar_lea.sflag [#allocation4], %s917_s1 }
 0x384   : > { %p1446_p13 = pnand %p2258_p11, %p2257_p3 }
 0x386   : > { %1747 = dma.done.wait (!%p1446_p13), %s918_s9, 512  }
 0x387   : > { %1749 = vsyncadd (!%p1446_p13), %s918_s9, 4294966784  ;;  %s28_s14 = sadd.s32 1, %s1772_s14   ;;  %s2259_s19 = smov %s2266_s12 }
 0x388   : > { %p25_p8 = scmp.ge.s32.totalorder %s28_s14, 4   ;;  %s2260_s30 = smov %s1756_s10 }
 0x389   : > { %s2261_s10 = smov %s1760_s11  ;;  %s2262_s11 = smov %s2034_s24 }
 0x38a   : > { %s2263_s12 = smov %s1768_s13  ;;  %s2264_s13 = smov %s2259_s19 }
 0x38b   :  { %27 = sbr.rel (!%p25_p8) target bundleno = 13 (0xd), region = 122 }
 0x392   :  { %923 = vsyncpa [#allocation3], 1 }
 0x393   :  { %925 = vsyncpa [#allocation3 + $0x1], 1 }
 0x394   :  { %926 = vsyncpa [#allocation7], 1 }
 0x395   :  { %927 = vsyncpa [#allocation10], 1 }
 0x396   :  { %928 = vsyncpa [#allocation4], 1 }
 0x397   :  { %930 = vsyncpa [#allocation4 + $0x1], 1 }
 0x398   :  { %931 = vsyncpa [#allocation5], 1 }
 0x399   :  { %933 = vsyncpa [#allocation5 + $0x1], 1 }

</bundles_post_ra>
